<compile_context>
chip_gen: v6e
topology: v6e:2x2x1
jax: 0.10.0
libtpu: 0.0.40
codegen_flags: <defaults>
</compile_context>

<pallas_src>
import functools

import jax
import jax.numpy as jnp
from jax.experimental import pallas as pl
from jax.experimental.pallas import tpu as pltpu

_LANE = 128      # lane width
_SUBLANE = 8     # f32 sublane tiling


def _round_up(x, m):
    return ((x + m - 1) // m) * m


def _choose_tile_m(batch, h_pad):
    """Batch tile: >=2 tiles when possible (v7x megacore), bounded padding."""
    # v7x has 64 MiB VMEM per TC: keep activation tiles smaller next to big slabs.
    cap = 128 if h_pad >= 2048 else 256
    if batch <= _SUBLANE:
        return _SUBLANE
    n_tiles = max(2, -(-batch // cap))               # ceil-div, at least 2 tiles
    return min(cap, _round_up(-(-batch // n_tiles), _SUBLANE))


def _actor_mlp_kernel(x_ref, wf_ref, bf_ref, wh_ref, bh_ref, wl_ref, bl_ref,
                      o_ref, *, num_hidden, action_scale):
    """One batch tile of the actor MLP.

    x_ref : (TM, S_pad)                 f32   input activations (zero-padded lanes)
    wf_ref: (S_pad, H_pad)              bf16  first-layer weight (K already small)
    bf_ref: (1, H_pad)                  f32
    wh_ref: (num_hidden, H_pad, H_pad)  bf16  hidden-layer weight slab (or dummy)
    bh_ref: (num_hidden, 1, H_pad)      f32
    wl_ref: (H_pad, A_pad)              f32   last layer kept in f32 (tiny)
    bl_ref: (1, A_pad)                  f32
    o_ref : (TM, A_pad)                 f32   action_scale * tanh(logits)
    """
    # Layer 0: contraction over the (padded) state width only, not H_pad.
    h = jnp.dot(x_ref[...].astype(jnp.bfloat16), wf_ref[...],
                preferred_element_type=jnp.float32) + bf_ref[...]
    h = jnp.maximum(h, 0.0)

    # Hidden H x H layers (static unroll; bf16 MXU inputs, f32 accumulation).
    for li in range(num_hidden):
        h = jnp.dot(h.astype(jnp.bfloat16), wh_ref[li],
                    preferred_element_type=jnp.float32) + bh_ref[li]
        h = jnp.maximum(h, 0.0)

    # Final layer, narrowed to A_pad lanes, in f32 for action precision.
    logits = jnp.dot(h, wl_ref[...], preferred_element_type=jnp.float32) + bl_ref[...]
    o_ref[...] = (action_scale * jnp.tanh(logits)).astype(o_ref.dtype)


def pack_actor_params(params):
    """Zero-pad & pack parameters once (hoist out of the per-step hot path).

    params: list of (W, b) with W: [in, out], b: [1, out]
    """
    state_size = params[0][0].shape[0]
    hdn = params[0][0].shape[1]
    action_size = params[-1][0].shape[1]
    num_hidden = len(params) - 2

    s_pad = _round_up(state_size, _LANE)
    h_pad = _round_up(hdn, _LANE)
    a_pad = _round_up(action_size, _LANE)

    def pad2(w, rows, cols):
        out = jnp.zeros((rows, cols), jnp.float32)
        return out.at[: w.shape[0], : w.shape[1]].set(w.astype(jnp.float32))

    w0, b0 = params[0]
    wn, bn = params[-1]
    packed = {
        "w_first": pad2(w0, s_pad, h_pad).astype(jnp.bfloat16),
        "b_first": pad2(b0.reshape(1, -1), 1, h_pad),
        # Last layer stays f32: tiny, and its error would pass straight to the action.
        "w_last": pad2(wn, h_pad, a_pad),
        "b_last": pad2(bn.reshape(1, -1), 1, a_pad),
    }
    if num_hidden > 0:
        wh = jnp.zeros((num_hidden, h_pad, h_pad), jnp.float32)
        bh = jnp.zeros((num_hidden, 1, h_pad), jnp.float32)
        for li, (w, b) in enumerate(params[1:-1]):
            wh = wh.at[li, : w.shape[0], : w.shape[1]].set(w.astype(jnp.float32))
            bh = bh.at[li, :1, : b.shape[-1]].set(b.reshape(1, -1).astype(jnp.float32))
        packed["w_hid"] = wh.astype(jnp.bfloat16)   # halves hidden-weight DMA bytes
        packed["b_hid"] = bh
    else:
        # Tiny unused dummies so the kernel signature stays fixed when hdn_lays == 0.
        packed["w_hid"] = jnp.zeros((1, _SUBLANE, _LANE), jnp.bfloat16)
        packed["b_hid"] = jnp.zeros((1, 1, _LANE), jnp.float32)
    return packed


@functools.partial(jax.jit,
                   static_argnames=("num_hidden", "action_size", "action_scale"))
def continuous_deterministic_actor_forward(x, packed, *, num_hidden, action_size,
                                           action_scale):
    """Actor MLP forward pass in a single Pallas call.

    x:      [batch, state_size] float32
    packed: output of pack_actor_params (built once, reused every step)
    returns [batch, action_size] float32
    """
    batch, state_size = x.shape
    wf, bf = packed["w_first"], packed["b_first"]
    wh, bh = packed["w_hid"], packed["b_hid"]
    wl, bl = packed["w_last"], packed["b_last"]
    s_pad, h_pad = wf.shape
    a_pad = wl.shape[1]

    tm = _choose_tile_m(batch, h_pad)
    batch_pad = _round_up(batch, tm)
    grid = (batch_pad // tm,)

    # Zero-pad the input batch/features (exact: padded lanes stay 0 throughout).
    x_pad = jnp.zeros((batch_pad, s_pad), jnp.float32)
    x_pad = x_pad.at[:batch, :state_size].set(x.astype(jnp.float32))

    kernel = functools.partial(_actor_mlp_kernel,
                               num_hidden=num_hidden,
                               action_scale=float(action_scale))

    def weight_spec(arr):
        # Grid-invariant, VMEM-resident, single-buffered (no point double-buffering).
        return pl.BlockSpec(arr.shape, lambda i: (0,) * arr.ndim,
                            pipeline_mode=pl.Buffered(1))

    # Cost estimate for the actually executed (split-layer, narrow-output) work.
    flops = 2 * batch_pad * (s_pad * h_pad
                             + num_hidden * h_pad * h_pad
                             + h_pad * a_pad)
    bytes_accessed = (x_pad.size * 4
                      + (wf.size + wh.size) * 2
                      + (bf.size + bh.size + wl.size + bl.size) * 4
                      + batch_pad * a_pad * 4)

    # VMEM budget: double-buffered activation in/out tiles + single-buffered
    # weights/biases + live activation temps, with ~50% headroom.
    act_bytes = 2 * tm * (s_pad + a_pad) * 4
    wgt_bytes = (wf.size + wh.size) * 2 + (bf.size + bh.size + wl.size + bl.size) * 4
    tmp_bytes = 4 * tm * h_pad * 4
    vmem_limit = int(min(max(int(1.5 * (act_bytes + wgt_bytes + tmp_bytes)),
                             32 << 20),
                         64 << 20))   # keep valid on v7x's 64 MiB per-TC VMEM

    out = pl.pallas_call(
        kernel,
        out_shape=jax.ShapeDtypeStruct((batch_pad, a_pad), jnp.float32),
        grid=grid,
        in_specs=[
            pl.BlockSpec((tm, s_pad), lambda i: (i, 0)),
            weight_spec(wf), weight_spec(bf),
            weight_spec(wh), weight_spec(bh),
            weight_spec(wl), weight_spec(bl),
        ],
        out_specs=pl.BlockSpec((tm, a_pad), lambda i: (i, 0)),
        compiler_params=pltpu.CompilerParams(
            dimension_semantics=("parallel",),
            vmem_limit_bytes=vmem_limit,
        ),
        cost_estimate=pl.CostEstimate(
            flops=flops,
            transcendentals=batch_pad * a_pad,
            bytes_accessed=bytes_accessed,
        ),
    )(x_pad, wf, bf, wh, bh, wl, bl)

    # Strip batch / feature padding.
    return out[:batch, :action_size]


def init_actor_params(key, state_size, action_size, hdn_chnls, hdn_lays):
    """Deterministic synthetic parameters (shapes match the PyTorch module)."""
    dims = [state_size] + [hdn_chnls] * (hdn_lays + 1) + [action_size]
    params = []
    for i in range(len(dims) - 1):
        key, kw, kb = jax.random.split(key, 3)
        fan_in, fan_out = dims[i], dims[i + 1]
        w = jax.random.normal(kw, (fan_in, fan_out), jnp.float32) * 0.1
        b = jax.random.normal(kb, (1, fan_out), jnp.float32) * 0.01
        params.append((w, b))
    return params


def reference_forward(x, params, action_scale):
    """Pure-JAX f32 reference for correctness checking."""
    h = x
    for i, (w, b) in enumerate(params):
        h = h @ w + b
        if i < len(params) - 1:
            h = jnp.maximum(h, 0.0)
    return action_scale * jnp.tanh(h)


if __name__ == "__main__":
    # Small shapes consistent with the module's forward signature:
    # status: [batch, state_size] -> action: [batch, action_size]
    batch = 2
    state_size = 16
    action_size = 8
    hdn_chnls = 32
    hdn_lays = 2
    action_scale = 2.0

    key = jax.random.PRNGKey(0)
    key, kx = jax.random.split(key)
    x = jax.random.normal(kx, (batch, state_size), jnp.float32)

    params = init_actor_params(key, state_size, action_size, hdn_chnls, hdn_lays)

    # Pack / pad weights ONCE (outside the hot loop), then run the jitted forward.
    packed = pack_actor_params(params)
    out = continuous_deterministic_actor_forward(
        x, packed,
        num_hidden=hdn_lays, action_size=action_size, action_scale=action_scale)
    out = jax.block_until_ready(out)

    ref = reference_forward(x, params, action_scale)
    assert out.shape == (batch, action_size)
    # Hidden layers use bf16 MXU inputs (f32 accumulation); final layer is f32.
    assert jnp.allclose(out, ref, atol=2e-2, rtol=2e-2), "mismatch vs reference"

    print("KERNEL_OK")
</pallas_src>

<mosaic_0001>
module attributes {stable_mosaic.version = 11 : i64} {
  func.func @_actor_mlp_kernel(%arg0: i32, %arg1: memref<8x128xf32, #tpu.memory_space<vmem>>, %arg2: memref<128x128xbf16, #tpu.memory_space<vmem>>, %arg3: memref<1x128xf32, #tpu.memory_space<vmem>>, %arg4: memref<2x128x128xbf16, #tpu.memory_space<vmem>>, %arg5: memref<2x1x128xf32, #tpu.memory_space<vmem>>, %arg6: memref<128x128xf32, #tpu.memory_space<vmem>>, %arg7: memref<1x128xf32, #tpu.memory_space<vmem>>, %arg8: memref<8x128xf32, #tpu.memory_space<vmem>>) attributes {dimension_semantics = [#tpu.dimension_semantics<parallel>], iteration_bounds = array<i64: 1>, scalar_prefetch = 0 : i64, scratch_operands = 0 : i64, tpu.core_type = #tpu.core_type<tc>, window_params = [{transform_indices = @transform_0, window_bounds = array<i64: 8, 128>}, {pipeline_mode = #tpu.pipeline_mode<synchronous>, transform_indices = @transform_1, window_bounds = array<i64: 128, 128>}, {pipeline_mode = #tpu.pipeline_mode<synchronous>, transform_indices = @transform_2, window_bounds = array<i64: 1, 128>}, {pipeline_mode = #tpu.pipeline_mode<synchronous>, transform_indices = @transform_3, window_bounds = array<i64: 2, 128, 128>}, {pipeline_mode = #tpu.pipeline_mode<synchronous>, transform_indices = @transform_4, window_bounds = array<i64: 2, 1, 128>}, {pipeline_mode = #tpu.pipeline_mode<synchronous>, transform_indices = @transform_5, window_bounds = array<i64: 128, 128>}, {pipeline_mode = #tpu.pipeline_mode<synchronous>, transform_indices = @transform_6, window_bounds = array<i64: 1, 128>}, {transform_indices = @transform_7, window_bounds = array<i64: 8, 128>}]} {
    %c0 = arith.constant 0 : index
    %c0_0 = arith.constant 0 : index
    %0 = vector.load %arg1[%c0, %c0_0] : memref<8x128xf32, #tpu.memory_space<vmem>>, vector<8x128xf32>
    %1 = arith.truncf %0 : vector<8x128xf32> to vector<8x128xbf16>
    %c0_1 = arith.constant 0 : index
    %c0_2 = arith.constant 0 : index
    %2 = vector.load %arg2[%c0_1, %c0_2] : memref<128x128xbf16, #tpu.memory_space<vmem>>, vector<128x128xbf16>
    %cst = arith.constant dense<0.000000e+00> : vector<8x128xf32>
    %3 = tpu.matmul %1, %2, %cst {dimension_numbers = #tpu.dot_dimension_numbers<[1], [0], [0], [1], [0, 0, 1, 1], [], []>} : vector<8x128xbf16>, vector<128x128xbf16>, vector<8x128xf32> -> vector<8x128xf32>
    %c0_3 = arith.constant 0 : index
    %c0_4 = arith.constant 0 : index
    %4 = vector.load %arg3[%c0_3, %c0_4] : memref<1x128xf32, #tpu.memory_space<vmem>>, vector<1x128xf32>
    %5 = vector.broadcast %4 : vector<1x128xf32> to vector<8x128xf32>
    %6 = arith.addf %3, %5 : vector<8x128xf32>
    %cst_5 = arith.constant 0.000000e+00 : f32
    %7 = vector.broadcast %cst_5 : f32 to vector<8x128xf32>
    %8 = arith.maximumf %6, %7 : vector<8x128xf32>
    %9 = arith.truncf %8 : vector<8x128xf32> to vector<8x128xbf16>
    %c0_6 = arith.constant 0 : index
    %c0_7 = arith.constant 0 : index
    %c0_8 = arith.constant 0 : index
    %10 = vector.load %arg4[%c0_6, %c0_7, %c0_8] : memref<2x128x128xbf16, #tpu.memory_space<vmem>>, vector<1x128x128xbf16>
    %11 = vector.shape_cast %10 : vector<1x128x128xbf16> to vector<128x128xbf16>
    %cst_9 = arith.constant dense<0.000000e+00> : vector<8x128xf32>
    %12 = tpu.matmul %9, %11, %cst_9 {dimension_numbers = #tpu.dot_dimension_numbers<[1], [0], [0], [1], [0, 0, 1, 1], [], []>} : vector<8x128xbf16>, vector<128x128xbf16>, vector<8x128xf32> -> vector<8x128xf32>
    %c0_10 = arith.constant 0 : index
    %c0_11 = arith.constant 0 : index
    %c0_12 = arith.constant 0 : index
    %13 = vector.load %arg5[%c0_10, %c0_11, %c0_12] : memref<2x1x128xf32, #tpu.memory_space<vmem>>, vector<1x1x128xf32>
    %14 = vector.shape_cast %13 : vector<1x1x128xf32> to vector<1x128xf32>
    %15 = vector.broadcast %14 : vector<1x128xf32> to vector<8x128xf32>
    %16 = arith.addf %12, %15 : vector<8x128xf32>
    %cst_13 = arith.constant 0.000000e+00 : f32
    %17 = vector.broadcast %cst_13 : f32 to vector<8x128xf32>
    %18 = arith.maximumf %16, %17 : vector<8x128xf32>
    %19 = arith.truncf %18 : vector<8x128xf32> to vector<8x128xbf16>
    %c1 = arith.constant 1 : index
    %c0_14 = arith.constant 0 : index
    %c0_15 = arith.constant 0 : index
    %20 = vector.load %arg4[%c1, %c0_14, %c0_15] : memref<2x128x128xbf16, #tpu.memory_space<vmem>>, vector<1x128x128xbf16>
    %21 = vector.shape_cast %20 : vector<1x128x128xbf16> to vector<128x128xbf16>
    %cst_16 = arith.constant dense<0.000000e+00> : vector<8x128xf32>
    %22 = tpu.matmul %19, %21, %cst_16 {dimension_numbers = #tpu.dot_dimension_numbers<[1], [0], [0], [1], [0, 0, 1, 1], [], []>} : vector<8x128xbf16>, vector<128x128xbf16>, vector<8x128xf32> -> vector<8x128xf32>
    %c1_17 = arith.constant 1 : index
    %c0_18 = arith.constant 0 : index
    %c0_19 = arith.constant 0 : index
    %23 = vector.load %arg5[%c1_17, %c0_18, %c0_19] : memref<2x1x128xf32, #tpu.memory_space<vmem>>, vector<1x1x128xf32>
    %24 = vector.shape_cast %23 : vector<1x1x128xf32> to vector<1x128xf32>
    %25 = vector.broadcast %24 : vector<1x128xf32> to vector<8x128xf32>
    %26 = arith.addf %22, %25 : vector<8x128xf32>
    %cst_20 = arith.constant 0.000000e+00 : f32
    %27 = vector.broadcast %cst_20 : f32 to vector<8x128xf32>
    %28 = arith.maximumf %26, %27 : vector<8x128xf32>
    %c0_21 = arith.constant 0 : index
    %c0_22 = arith.constant 0 : index
    %29 = vector.load %arg6[%c0_21, %c0_22] : memref<128x128xf32, #tpu.memory_space<vmem>>, vector<128x128xf32>
    %cst_23 = arith.constant dense<0.000000e+00> : vector<8x128xf32>
    %30 = tpu.matmul %28, %29, %cst_23 {dimension_numbers = #tpu.dot_dimension_numbers<[1], [0], [0], [1], [0, 0, 1, 1], [], []>} : vector<8x128xf32>, vector<128x128xf32>, vector<8x128xf32> -> vector<8x128xf32>
    %c0_24 = arith.constant 0 : index
    %c0_25 = arith.constant 0 : index
    %31 = vector.load %arg7[%c0_24, %c0_25] : memref<1x128xf32, #tpu.memory_space<vmem>>, vector<1x128xf32>
    %32 = vector.broadcast %31 : vector<1x128xf32> to vector<8x128xf32>
    %33 = arith.addf %30, %32 : vector<8x128xf32>
    %34 = math.tanh %33 : vector<8x128xf32>
    %cst_26 = arith.constant 2.000000e+00 : f32
    %35 = vector.broadcast %cst_26 : f32 to vector<8x128xf32>
    %36 = arith.mulf %35, %34 : vector<8x128xf32>
    %c0_27 = arith.constant 0 : index
    %c0_28 = arith.constant 0 : index
    %37 = vector.load %arg8[%c0_27, %c0_28] : memref<8x128xf32, #tpu.memory_space<vmem>>, vector<8x128xf32>
    tpu.vector_store %arg8[%c0_27, %c0_28], %36 {strides = array<i32>} : memref<8x128xf32, #tpu.memory_space<vmem>>, vector<8x128xf32>,
    return
  }
  func.func @transform_0(%arg0: i32) -> (i32, i32) {
    %c0_i32 = arith.constant 0 : i32
    %c0_i32_0 = arith.constant 0 : i32
    return %arg0, %c0_i32 : i32, i32
  }
  func.func @transform_1(%arg0: i32) -> (i32, i32) {
    %c0_i32 = arith.constant 0 : i32
    %c0_i32_0 = arith.constant 0 : i32
    %c0_i32_1 = arith.constant 0 : i32
    return %c0_i32, %c0_i32_0 : i32, i32
  }
  func.func @transform_2(%arg0: i32) -> (i32, i32) {
    %c0_i32 = arith.constant 0 : i32
    %c0_i32_0 = arith.constant 0 : i32
    %c0_i32_1 = arith.constant 0 : i32
    return %c0_i32, %c0_i32_0 : i32, i32
  }
  func.func @transform_3(%arg0: i32) -> (i32, i32, i32) {
    %c0_i32 = arith.constant 0 : i32
    %c0_i32_0 = arith.constant 0 : i32
    %c0_i32_1 = arith.constant 0 : i32
    %c0_i32_2 = arith.constant 0 : i32
    return %c0_i32, %c0_i32_0, %c0_i32_1 : i32, i32, i32
  }
  func.func @transform_4(%arg0: i32) -> (i32, i32, i32) {
    %c0_i32 = arith.constant 0 : i32
    %c0_i32_0 = arith.constant 0 : i32
    %c0_i32_1 = arith.constant 0 : i32
    %c0_i32_2 = arith.constant 0 : i32
    return %c0_i32, %c0_i32_0, %c0_i32_1 : i32, i32, i32
  }
  func.func @transform_5(%arg0: i32) -> (i32, i32) {
    %c0_i32 = arith.constant 0 : i32
    %c0_i32_0 = arith.constant 0 : i32
    %c0_i32_1 = arith.constant 0 : i32
    return %c0_i32, %c0_i32_0 : i32, i32
  }
  func.func @transform_6(%arg0: i32) -> (i32, i32) {
    %c0_i32 = arith.constant 0 : i32
    %c0_i32_0 = arith.constant 0 : i32
    %c0_i32_1 = arith.constant 0 : i32
    return %c0_i32, %c0_i32_0 : i32, i32
  }
  func.func @transform_7(%arg0: i32) -> (i32, i32) {
    %c0_i32 = arith.constant 0 : i32
    %c0_i32_0 = arith.constant 0 : i32
    return %arg0, %c0_i32 : i32, i32
  }
}

</mosaic_0001>

<bundles_post_ra>
// kernel: continuous_deterministic_actor_forward.1
= control target key start
LH: loop header
LB: loop body
LE: loop exit
PB: predicated region body
PF: predicated region fallthrough
CT: control target
= control target key end

     0   :  { %12 = vsyncpa [#allocation3], 0  ;;  %s903_s0 = inlined_call_operand.vmem [shape: f32[8,128], index: 0, kind: input, shape index: {}]   ;;  %s904_s1 = inlined_call_operand.hbm [shape: bf16[128,128], index: 1, kind: input, shape index: {}]   ;;  %s905_s2 = inlined_call_operand.vmem [shape: f32[1,128], index: 2, kind: input, shape index: {}]   ;;  %s906_s3 = inlined_call_operand.hbm [shape: bf16[2,128,128], index: 3, kind: input, shape index: {}]   ;;  %s907_s4 = inlined_call_operand.vmem [shape: f32[2,1,128], index: 4, kind: input, shape index: {}]   ;;  %s908_s5 = inlined_call_operand.hbm [shape: f32[128,128], index: 5, kind: input, shape index: {}]   ;;  %s909_s6 = inlined_call_operand.vmem [shape: f32[1,128], index: 6, kind: input, shape index: {}]   ;;  %s910_s7 = inlined_call_operand.vmem [shape: f32[8,128], index: 7, kind: output, shape index: {}]  }
   0x1   :  { %13 = vsyncpa [#allocation5], 0  ;;  %s779_s24 = smov [#allocation4]   ;;  %s780_s26 = smov [#allocation2]  }
   0x2   :  { %s35_s25 = sshll.u32 %s779_s24, 4  ;;  %s21_s27 = sshll.u32 %s780_s26, 4  ;;  %s36_s25 = int_to_ptr.vmem [resolvable:$true] %s35_s25  ;;  %s22_s27 = int_to_ptr.vmem [resolvable:$true] %s21_s27 }
   0x3   :  { %s723_s28 = scalar_lea.vmem %s36_s25, 2048  ;;  %p728_p1 = scmp.lt.s32.totalorder %s36_s25, %s36_s25 }
   0x4   :  { %p724_p0 = scmp.ne.s32.totalorder %s36_s25, %s723_s28  ;;  %p729_p2 = scmp.lt.s32.totalorder %s723_s28, %s723_s28 }
   0x6   :  { %p730_p3 = por %p729_p2, %p728_p1 }
   0x8   :  { %p731_p4 = pnand %p730_p3, %p724_p0 }
   0xa   :  { %734 = shalt.err (!%p731_p4)
}
   0xb   :  { %s781_s29 = smov 64   ;;  %s782_s30 = smov 4  }
   0xc   :  { %41 = dma.hbm_to_vmem [thread:$0]  %s906_s3, 2048, %s36_s25, [#allocation5], %s781_s29, %s781_s29, %s782_s30  }
   0xd   :  { %s743_s10 = scalar_lea.vmem %s22_s27, 1024  ;;  %p748_p6 = scmp.lt.s32.totalorder %s22_s27, %s22_s27 }
   0xe   :  { %p744_p5 = scmp.ne.s32.totalorder %s22_s27, %s743_s10  ;;  %p749_p7 = scmp.lt.s32.totalorder %s743_s10, %s743_s10 }
  0x10   :  { %p750_p8 = por %p749_p7, %p748_p6 }
  0x12   :  { %p751_p9 = pnand %p750_p8, %p744_p5 }
  0x14   :  { %754 = shalt.err (!%p751_p9)
}
  0x15   :  { %27 = dma.hbm_to_vmem [thread:$0]  %s904_s1, 1024, %s22_s27, [#allocation3], %s781_s29, %s781_s29, %s782_s30  }
  0x16   :  { %s783_s13 = smov [#allocation6]  }
  0x17   :  { %s49_s14 = sshll.u32 %s783_s13, 4  ;;  %s50_s14 = int_to_ptr.vmem [resolvable:$true] %s49_s14 }
  0x18   :  { %s763_s15 = scalar_lea.vmem %s50_s14, 2048  ;;  %p768_p11 = scmp.lt.s32.totalorder %s50_s14, %s50_s14 }
  0x19   :  { %p764_p10 = scmp.ne.s32.totalorder %s50_s14, %s763_s15  ;;  %p769_p12 = scmp.lt.s32.totalorder %s763_s15, %s763_s15 }
  0x1b   :  { %p770_p13 = por %p769_p12, %p768_p11 }
  0x1d   :  { %p771_p0 = pnand %p770_p13, %p764_p10 }
  0x1f   :  { %774 = shalt.err (!%p771_p0)
}
  0x20   :  { %s784_s3 = smov 128   ;;  %s785_s16 = smov 8  }
  0x21   :  { %55 = dma.hbm_to_vmem [thread:$0]  %s908_s5, 2048, %s50_s14, [#allocation5], %s784_s3, %s784_s3, %s785_s16  }
  0x22   :  { %775 = dma.done.wait [#allocation3], 1024  }
  0x23   :  { %776 = vsyncadd [#allocation3], 4294966272 }
  0x24   :  { %777 = dma.done.wait [#allocation5], 4096  }
  0x25   :  { %778 = vsyncadd [#allocation5], 4294963200  ;;  %v786_v0 = vmov 0.0   ;;  %vm787_vm0 = vmmov 0   ;;  %v689_v1 = vld [vmem:[#allocation2 + $0x38] sm:$0xff]   ;;  %v690_v2 = vld [vmem:[#allocation2 + $0x30] sm:$0xff]  }
  0x26   :  { %585 = vmatprep.subr.bf16.mxu0 %v786_v0  ;;  %601 = vmatprep.mubr.msk.bf16.mxu0 %vm787_vm0, %v786_v0  ;;  %v691_v3 = vld [vmem:[#allocation2 + $0x28] sm:$0xff]   ;;  %v697_v4 = vld [vmem:[#allocation4 + $0x38] sm:$0xff]   ;;  %v692_v5 = vld [vmem:[#allocation2 + $0x20] sm:$0xff]  }
  0x27   :  { %605 = vmatprep.subr.bf16.mxu1 %v786_v0  ;;  %621 = vmatprep.mubr.msk.bf16.mxu1 %vm787_vm0, %v786_v0  ;;  %v698_v6 = vld [vmem:[#allocation4 + $0x30] sm:$0xff]   ;;  %v693_v7 = vld [vmem:[#allocation2 + $0x18] sm:$0xff]   ;;  %v699_v8 = vld [vmem:[#allocation4 + $0x28] sm:$0xff]  }
  0x28   :  { %586 = vmatpush3.bf16.msra.mxu0 %v689_v1  ;;  %606 = vmatpush3.bf16.msra.mxu1 %v697_v4  ;;  %v694_v9 = vld [vmem:[#allocation2 + $0x10] sm:$0xff]   ;;  %v700_v10 = vld [vmem:[#allocation4 + $0x20] sm:$0xff]   ;;  %v695_v11 = vld [vmem:[#allocation2 + $0x8] sm:$0xff]  }
  0x29   :  { %587 = vmatprep.subr.bf16.mxu0 %v786_v0  ;;  %607 = vmatprep.subr.bf16.mxu1 %v786_v0  ;;  %v701_v12 = vld [vmem:[#allocation4 + $0x18] sm:$0xff]   ;;  %v696_v13 = vld [vmem:[#allocation2] sm:$0xff]   ;;  %v702_v15 = vld [vmem:[#allocation4 + $0x10] sm:$0xff]  }
  0x2a   :  { %v68_v14 = vld [vmem:[%s903_s0] sm:$0xff]  ;;  %v703_v17 = vld [vmem:[#allocation4 + $0x8] sm:$0xff]   ;;  %v705_v19 = vld [vmem:[#allocation4 + $0x78] sm:$0xff]  }
  0x2b   :  { %v69_v16 = vpack.c.bf16 %v68_v14, %v68_v14  ;;  %v704_v18 = vld [vmem:[#allocation4] sm:$0xff]   ;;  %v706_v20 = vld [vmem:[#allocation4 + $0x70] sm:$0xff]   ;;  %v707_v21 = vld [vmem:[#allocation4 + $0x68] sm:$0xff]  }
  0x2c   :  { %588 = vmatpush3.bf16.msra.mxu0 %v690_v2  ;;  %608 = vmatpush3.bf16.msra.mxu1 %v698_v6  ;;  %v708_v22 = vld [vmem:[#allocation4 + $0x60] sm:$0xff]   ;;  %v709_v23 = vld [vmem:[#allocation4 + $0x58] sm:$0xff]   ;;  %v710_v24 = vld [vmem:[#allocation4 + $0x50] sm:$0xff]  }
  0x2d   :  { %589 = vmatprep.subr.bf16.mxu0 %v786_v0  ;;  %609 = vmatprep.subr.bf16.mxu1 %v786_v0  ;;  %v512_v25 = vld [vmem:[%s905_s2] ss:$0 sm:$0xff]  ;;  %v711_v33 = vld [vmem:[#allocation4 + $0x48] sm:$0xff]   ;;  %v425_v35 = vld [vmem:[#allocation6 + $0x78] sm:$0xff] }
  0x2e   :  { %v712_v34 = vld [vmem:[#allocation4 + $0x40] sm:$0xff]   ;;  %v424_v36 = vld [vmem:[#allocation6 + $0x70] sm:$0xff]  ;;  %v423_v37 = vld [vmem:[#allocation6 + $0x68] sm:$0xff] }
  0x2f   :  { %v422_v38 = vld [vmem:[#allocation6 + $0x60] sm:$0xff]  ;;  %v421_v39 = vld [vmem:[#allocation6 + $0x58] sm:$0xff]  ;;  %v420_v40 = vld [vmem:[#allocation6 + $0x50] sm:$0xff] }
  0x30   :  { %590 = vmatpush3.bf16.msra.mxu0 %v691_v3  ;;  %610 = vmatpush3.bf16.msra.mxu1 %v699_v8  ;;  %v419_v41 = vld [vmem:[#allocation6 + $0x48] sm:$0xff]  ;;  %v418_v42 = vld [vmem:[#allocation6 + $0x40] sm:$0xff]  ;;  %v417_v43 = vld [vmem:[#allocation6 + $0x38] sm:$0xff] }
  0x31   :  { %591 = vmatprep.subr.bf16.mxu0 %v786_v0  ;;  %611 = vmatprep.subr.bf16.mxu1 %v786_v0  ;;  %v416_v44 = vld [vmem:[#allocation6 + $0x30] sm:$0xff]  ;;  %v415_v45 = vld [vmem:[#allocation6 + $0x28] sm:$0xff]  ;;  %v414_v46 = vld [vmem:[#allocation6 + $0x20] sm:$0xff] }
  0x32   :  { %v413_v47 = vld [vmem:[#allocation6 + $0x18] sm:$0xff]  ;;  %v521_v48 = vld [vmem:[%s907_s4] ss:$0 sm:$0xff]  ;;  %v412_v56 = vld [vmem:[#allocation6 + $0x10] sm:$0xff] }
  0x33   :  { %v411_v57 = vld [vmem:[#allocation6 + $0x8] sm:$0xff]  ;;  %v410_v58 = vld [vmem:[#allocation6] sm:$0xff] }
  0x34   :  { %592 = vmatpush3.bf16.msra.mxu0 %v692_v5  ;;  %612 = vmatpush3.bf16.msra.mxu1 %v700_v10  ;;  %v531_v59 = vld [vmem:[%s907_s4 + $0x1] ss:$0 sm:$0xff]  ;;  %v540_v3 = vld [vmem:[%s909_s6] ss:$0 sm:$0xff] }
  0x35   :  { %593 = vmatprep.subr.bf16.mxu0 %v786_v0  ;;  %613 = vmatprep.subr.bf16.mxu1 %v786_v0 }
  0x38   :  { %594 = vmatpush3.bf16.msra.mxu0 %v693_v7  ;;  %614 = vmatpush3.bf16.msra.mxu1 %v701_v12 }
  0x39   :  { %595 = vmatprep.subr.bf16.mxu0 %v786_v0  ;;  %615 = vmatprep.subr.bf16.mxu1 %v786_v0 }
  0x3c   :  { %596 = vmatpush3.bf16.msra.mxu0 %v694_v9  ;;  %616 = vmatpush3.bf16.msra.mxu1 %v702_v15 }
  0x3d   :  { %597 = vmatprep.subr.bf16.mxu0 %v786_v0  ;;  %617 = vmatprep.subr.bf16.mxu1 %v786_v0 }
  0x40   :  { %598 = vmatpush3.bf16.msra.mxu0 %v695_v11  ;;  %618 = vmatpush3.bf16.msra.mxu1 %v703_v17 }
  0x41   :  { %599 = vmatprep.subr.bf16.mxu0 %v786_v0  ;;  %619 = vmatprep.subr.bf16.mxu1 %v786_v0 }
  0x44   :  { %600 = vmatpush3.bf16.msra.mxu0 %v696_v13  ;;  %620 = vmatpush3.bf16.msra.mxu1 %v704_v18 }
  0x45   :  { %625 = vmatprep.subr.bf16.mxu0 %v786_v0  ;;  %645 = vmatprep.subr.mxu1 %v786_v0 }
  0x47   :  { %602 = vmatmul.mubr.bf16.vlgmr.msra.gmra.mxu0 %v69_v16 }
  0x48   :  { %641 = vmatprep.mubr.msk.bf16.mxu0 %vm787_vm0, %v786_v0  ;;  %626 = vmatpush3.bf16.msra.mxu0 %v705_v19 }
  0x49   :  { %627 = vmatprep.subr.bf16.mxu0 %v786_v0 }
  0x4c   :  { %628 = vmatpush3.bf16.msra.mxu0 %v706_v20 }
  0x4d   :  { %629 = vmatprep.subr.bf16.mxu0 %v786_v0 }
  0x50   :  { %630 = vmatpush3.bf16.msra.mxu0 %v707_v21 }
  0x51   :  { %631 = vmatprep.subr.bf16.mxu0 %v786_v0 }
  0x54   :  { %632 = vmatpush3.bf16.msra.mxu0 %v708_v22 }
  0x55   :  { %633 = vmatprep.subr.bf16.mxu0 %v786_v0 }
  0x58   :  { %634 = vmatpush3.bf16.msra.mxu0 %v709_v23 }
  0x59   :  { %635 = vmatprep.subr.bf16.mxu0 %v786_v0 }
  0x5c   :  { %636 = vmatpush3.bf16.msra.mxu0 %v710_v24 }
  0x5d   :  { %637 = vmatprep.subr.bf16.mxu0 %v786_v0 }
  0x60   :  { %638 = vmatpush3.bf16.msra.mxu0 %v711_v33 }
  0x61   :  { %639 = vmatprep.subr.bf16.mxu0 %v786_v0 }
  0x64   :  { %640 = vmatpush3.bf16.msra.mxu0 %v712_v34 }
 0x107   :  { %v175_v26 = vpop.f32.mrf.mxu0 }
 0x108   :  { %v176_v27 = vadd.f32 %v512_v25, %v175_v26 }
 0x109   :  { %v603_v28 = vpop.f32.mrf.mxu0 }
 0x10a   :  { %v181_v29 = vmax.f32 %v176_v27, 0.0 }
 0x10b   :  { %v178_v30 = vpop.f32.mrf.mxu0 }
 0x10c   :  { %v182_v31 = vpack.c.bf16 %v181_v29, %v181_v29 }
 0x10d   :  { %v604_v32 = vpop.f32.mrf.mxu0 }
 0x10e   :  { %622 = vmatmul.mubr.bf16.vlgmr.msra.gmra.mxu1 %v182_v31 }
 0x10f   :  { %677 = vmatprep.mubr.msk.f32.mxu1 %vm787_vm0, %v786_v0  ;;  %646 = vmatpush3.msra.mxu1 %v425_v35 }
 0x110   :  { %647 = vmatprep.subr.mxu1 %v786_v0 }
 0x111   :  { %648 = vmatpush3.msra.mxu1 %v424_v36 }
 0x112   :  { %649 = vmatprep.subr.mxu1 %v786_v0 }
 0x113   :  { %650 = vmatpush3.msra.mxu1 %v423_v37 }
 0x114   :  { %651 = vmatprep.subr.mxu1 %v786_v0 }
 0x115   :  { %652 = vmatpush3.msra.mxu1 %v422_v38 }
 0x116   :  { %653 = vmatprep.subr.mxu1 %v786_v0 }
 0x117   :  { %654 = vmatpush3.msra.mxu1 %v421_v39 }
 0x118   :  { %655 = vmatprep.subr.mxu1 %v786_v0 }
 0x119   :  { %656 = vmatpush3.msra.mxu1 %v420_v40 }
 0x11a   :  { %657 = vmatprep.subr.mxu1 %v786_v0 }
 0x11b   :  { %658 = vmatpush3.msra.mxu1 %v419_v41 }
 0x11c   :  { %659 = vmatprep.subr.mxu1 %v786_v0 }
 0x11d   :  { %660 = vmatpush3.msra.mxu1 %v418_v42 }
 0x11e   :  { %661 = vmatprep.subr.mxu1 %v786_v0 }
 0x11f   :  { %662 = vmatpush3.msra.mxu1 %v417_v43 }
 0x120   :  { %663 = vmatprep.subr.mxu1 %v786_v0 }
 0x121   :  { %664 = vmatpush3.msra.mxu1 %v416_v44 }
 0x122   :  { %665 = vmatprep.subr.mxu1 %v786_v0 }
 0x123   :  { %666 = vmatpush3.msra.mxu1 %v415_v45 }
 0x124   :  { %667 = vmatprep.subr.mxu1 %v786_v0 }
 0x125   :  { %668 = vmatpush3.msra.mxu1 %v414_v46 }
 0x126   :  { %669 = vmatprep.subr.mxu1 %v786_v0 }
 0x127   :  { %670 = vmatpush3.msra.mxu1 %v413_v47 }
 0x128   :  { %671 = vmatprep.subr.mxu1 %v786_v0 }
 0x129   :  { %672 = vmatpush3.msra.mxu1 %v412_v56 }
 0x12a   :  { %673 = vmatprep.subr.mxu1 %v786_v0 }
 0x12b   :  { %674 = vmatpush3.msra.mxu1 %v411_v57 }
 0x12c   :  { %675 = vmatprep.subr.mxu1 %v786_v0 }
 0x12d   :  { %676 = vmatpush3.msra.mxu1 %v410_v58 }
 0x1ce   :  { %v288_v49 = vpop.f32.mrf.mxu1 }
 0x1cf   :  { %v289_v50 = vadd.f32 %v521_v48, %v288_v49 }
 0x1d0   :  { %v623_v51 = vpop.f32.mrf.mxu1 }
 0x1d1   :  { %v294_v52 = vmax.f32 %v289_v50, 0.0 }
 0x1d2   :  { %v291_v53 = vpop.f32.mrf.mxu1 }
 0x1d3   :  { %v295_v54 = vpack.c.bf16 %v294_v52, %v294_v52 }
 0x1d4   :  { %v624_v55 = vpop.f32.mrf.mxu1 }
 0x1d5   :  { %642 = vmatmul.mubr.bf16.vlgmr.msra.gmra.mxu0 %v295_v54 }
 0x295   :  { %v403_v60 = vpop.f32.mrf.mxu0 }
 0x296   :  { %v404_v61 = vadd.f32 %v531_v59, %v403_v60 }
 0x297   :  { %v643_v62 = vpop.f32.mrf.mxu0 }
 0x298   :  { %v409_v63 = vmax.f32 %v404_v61, 0.0 }
 0x299   :  { %v406_v1 = vpop.f32.mrf.mxu0 }
 0x29a   :  { %678 = vmatmul.mubr.f32.vlgmr.msra.gmra.mxu1 %v409_v63 }
 0x29b   :  { %v644_v2 = vpop.f32.mrf.mxu0 }
 0x35a   :  { %v499_v4 = vpop.f32.mrf.mxu1 }
 0x35b   :  { %v500_v5 = vadd.f32 %v540_v3, %v499_v4 }
 0x35c   :  { %v679_v0 = vpop.f32.mrf.mxu1 }
 0x35d   :  { %713 = vtanh.f32 %v500_v5 }
 0x36a   :  { %v714_v6 = vpop.eup %713 }
 0x36b   :  { %v504_v7 = vmul.f32 2.0, %v714_v6 }
 0x36d   :  { %505 = vst [vmem:[%s910_s7] sm:$0xff] %v504_v7 }
 0x36e   :  { %510 = vsyncpa [#allocation3], 1 }
 0x36f   :  { %511 = vsyncpa [#allocation5], 1 }

</bundles_post_ra>
